<compile_context>
chip_gen: v6e
topology: v6e:2x2x1
jax: 0.10.0
libtpu: 0.0.40
codegen_flags: <defaults>
</compile_context>

<pallas_src>
import functools

import jax
import jax.numpy as jnp
from jax import lax
from jax.experimental import pallas as pl
from jax.experimental.pallas import tpu as pltpu


# ---------------------------------------------------------------------------
# Kernel
# ---------------------------------------------------------------------------
def _actor_kernel(x_ref, w_in_ref, b_in_ref, w_u_ref, b_u_ref,
                  w_hn_ref, w_hu_ref, b_h_ref, out_ref, *, rb_cols):
    # x = torch.abs(x); net = self.net(x)
    x = jnp.abs(x_ref[...].astype(jnp.float32))
    net = jnp.dot(x.astype(jnp.bfloat16), w_in_ref[...],
                  preferred_element_type=jnp.float32) + b_in_ref[...]

    # User branch: 4 relu'd (H, H) layers (the only non-linear hidden path).
    u = net
    for i in range(4):
        u = jnp.dot(u.astype(jnp.bfloat16), w_u_ref[i],
                    preferred_element_type=jnp.float32) + b_u_ref[i]
        u = jnp.maximum(u, 0.0)

    # Heads.  w_hn holds the FOLDED r/b linear chains (their five layers are
    # affine, so they collapse to one matrix + bias) on the r/b columns;
    # w_hu holds the user head replicated r_dim times on the user columns.
    # Both are padded to a 128-multiple column count -> one lane-dense store.
    y = (jnp.dot(net.astype(jnp.bfloat16), w_hn_ref[...],
                 preferred_element_type=jnp.float32)
         + jnp.dot(u.astype(jnp.bfloat16), w_hu_ref[...],
                   preferred_element_type=jnp.float32)
         + b_h_ref[...])

    # Final torch.abs: r/b columns were relu'd in torch (abs is then a no-op),
    # user columns get a plain abs.  Mask is a (1, OUT_pad) row broadcast.
    cols = lax.broadcasted_iota(jnp.int32, (1, y.shape[1]), 1)
    y = jnp.where(cols < rb_cols, jnp.maximum(y, 0.0), jnp.abs(y))
    out_ref[...] = y.astype(out_ref.dtype)


# ---------------------------------------------------------------------------
# Parameter construction (PyTorch-like Linear init) and packing
# ---------------------------------------------------------------------------
def init_linear(key, fan_in, fan_out, init_w=None):
    """U(-1/sqrt(in), 1/sqrt(in)) default; final r/b heads use U(-init_w, init_w)."""
    kw, kb = jax.random.split(key)
    bound = init_w if init_w is not None else 1.0 / jnp.sqrt(fan_in)
    w = jax.random.uniform(kw, (fan_in, fan_out), jnp.float32, -bound, bound)
    b = jax.random.uniform(kb, (1, fan_out), jnp.float32, -bound, bound)
    return w, b


def make_actor_params(key, state_dim, r_dim, b_dim, o_dim, hidden_dim,
                      init_w=0.003):
    u_dim = o_dim // r_dim
    keys = jax.random.split(key, 16)
    p = []
    p += list(init_linear(keys[0], state_dim, hidden_dim))            # net
    # r branch
    p += list(init_linear(keys[1], hidden_dim, hidden_dim))
    p += list(init_linear(keys[2], hidden_dim, hidden_dim))
    p += list(init_linear(keys[3], hidden_dim, hidden_dim))
    p += list(init_linear(keys[4], hidden_dim, hidden_dim))
    p += list(init_linear(keys[5], hidden_dim, r_dim, init_w))
    # b branch
    p += list(init_linear(keys[6], hidden_dim, hidden_dim))
    p += list(init_linear(keys[7], hidden_dim, hidden_dim))
    p += list(init_linear(keys[8], hidden_dim, hidden_dim))
    p += list(init_linear(keys[9], hidden_dim, hidden_dim))
    p += list(init_linear(keys[10], hidden_dim, b_dim, init_w))
    # user layer (last Linear keeps the default init, as in the torch module)
    p += list(init_linear(keys[11], hidden_dim, hidden_dim))
    p += list(init_linear(keys[12], hidden_dim, hidden_dim))
    p += list(init_linear(keys[13], hidden_dim, hidden_dim))
    p += list(init_linear(keys[14], hidden_dim, hidden_dim))
    p += list(init_linear(keys[15], hidden_dim, u_dim))
    return p


def _round_up(n, m):
    return ((n + m - 1) // m) * m


def pack_actor_params(params, *, hidden_dim, r_dim, b_dim, u_dim,
                      dot_dtype=jnp.bfloat16):
    """Pack the 32 Linear params into 7 arrays (done once, in f32)."""
    p = params
    H = hidden_dim
    OUT = r_dim + b_dim + r_dim * u_dim
    OUT_P = _round_up(OUT, 128)          # lane-dense head / output columns

    w_in, b_in = p[0], p[1]

    # Fold an affine chain: y = (((x@w1+b1)@w2+b2)...)@w5+b5 -> x@W + B.
    def fold(idx0):
        w, b = p[idx0], p[idx0 + 1]
        for j in range(1, 5):
            wj, bj = p[idx0 + 2 * j], p[idx0 + 2 * j + 1]
            w = w @ wj
            b = b @ wj + bj
        return w, b

    w_r, b_r = fold(2)                   # (H, r_dim), (1, r_dim)
    w_b, b_b = fold(12)                  # (H, b_dim), (1, b_dim)

    # User branch stays unfused (ReLU between layers).
    w_u = jnp.stack([p[22 + 2 * i] for i in range(4)], axis=0)   # (4, H, H)
    b_u = jnp.stack([p[23 + 2 * i] for i in range(4)], axis=0)   # (4, 1, H)
    w5u, b5u = p[30], p[31]                                       # (H, u_dim)

    # Head from `net`: folded r / b chains on the first r_dim + b_dim columns.
    w_head_net = jnp.zeros((H, OUT_P), jnp.float32)
    w_head_net = w_head_net.at[:, :r_dim].set(w_r)
    w_head_net = w_head_net.at[:, r_dim:r_dim + b_dim].set(w_b)

    # Head from the user hidden: user head replicated r_dim times.
    w_head_u = jnp.zeros((H, OUT_P), jnp.float32)
    b_head = jnp.zeros((1, OUT_P), jnp.float32)
    b_head = b_head.at[:, :r_dim].set(b_r)
    b_head = b_head.at[:, r_dim:r_dim + b_dim].set(b_b)
    for i in range(r_dim):
        c = r_dim + b_dim + i * u_dim
        w_head_u = w_head_u.at[:, c:c + u_dim].set(w5u)
        b_head = b_head.at[:, c:c + u_dim].set(b5u)

    cast = lambda w: w.astype(dot_dtype)
    return (cast(w_in), b_in, cast(w_u), b_u,
            cast(w_head_net), cast(w_head_u), b_head)


# ---------------------------------------------------------------------------
# Forward wrapper
# ---------------------------------------------------------------------------
def _vmem_limit_bytes(TB, S, H, OUT_P):
    # weights (bf16) + biases (f32), doubled for default double-buffering
    w_bytes = 2 * ((S * H + 4 * H * H + 2 * H * OUT_P) * 2
                   + (5 * H + OUT_P) * 4)
    io_bytes = 2 * (TB * S * 4 + TB * OUT_P * 4)        # x / out tiles, 2-buf
    act_bytes = 4 * TB * (S + 2 * H + OUT_P) * 4        # live activations
    est = int(1.5 * (w_bytes + io_bytes + act_bytes)) + (4 << 20)
    # floor above v5e's scoped default, cap safely under v7x's 64 MiB VMEM
    return max(16 << 20, min(est, 48 << 20))


def actor_forward(x, packed, *, hidden_dim, r_dim, b_dim, u_dim,
                  batch_tile=1024):
    B, S = x.shape
    H = hidden_dim
    OUT = r_dim + b_dim + r_dim * u_dim
    w_in, b_in, w_u, b_u, w_hn, w_hu, b_h = packed
    OUT_P = w_hn.shape[1]

    # Batch tile: large (weights are resident, only x/out stream), but capped
    # so that B >= 16 always yields >= 2 grid steps (v7x: both TensorCores).
    TB = min(batch_tile, B)
    if B >= 16:
        TB = min(TB, _round_up(-(-B // 2), 8))
    if TB != B:
        TB = max(8, (TB // 8) * 8)
    grid = (pl.cdiv(B, TB),)

    def full_spec(a):
        nd = a.ndim
        return pl.BlockSpec(a.shape, lambda i, nd=nd: (0,) * nd)

    kernel = functools.partial(_actor_kernel, rb_cols=r_dim + b_dim)

    out_padded = pl.pallas_call(
        kernel,
        out_shape=jax.ShapeDtypeStruct((B, OUT_P), jnp.float32),
        grid=grid,
        in_specs=[pl.BlockSpec((TB, S), lambda i: (i, 0)),
                  full_spec(w_in), full_spec(b_in),
                  full_spec(w_u), full_spec(b_u),
                  full_spec(w_hn), full_spec(w_hu), full_spec(b_h)],
        out_specs=pl.BlockSpec((TB, OUT_P), lambda i: (i, 0)),
        compiler_params=pltpu.CompilerParams(
            dimension_semantics=("parallel",),
            vmem_limit_bytes=_vmem_limit_bytes(TB, S, H, OUT_P)),
    )(x, w_in, b_in, w_u, b_u, w_hn, w_hu, b_h)

    return out_padded[:, :OUT] if OUT_P != OUT else out_padded


# ---------------------------------------------------------------------------
# References
# ---------------------------------------------------------------------------
def actor_reference(x, params, r_dim, b_dim, o_dim):
    """Pure f32 reference with exact PyTorch semantics (no fold, no bf16)."""
    p = params
    lin = lambda h, w, b: jnp.dot(h, w, preferred_element_type=jnp.float32) + b
    x = jnp.abs(x)
    net = lin(x, p[0], p[1])
    r = net
    for i in range(4):
        r = lin(r, p[2 + 2 * i], p[3 + 2 * i])
    r = jax.nn.relu(lin(r, p[10], p[11]))
    bb = net
    for i in range(4):
        bb = lin(bb, p[12 + 2 * i], p[13 + 2 * i])
    bb = jax.nn.relu(lin(bb, p[20], p[21]))
    u = net
    for i in range(4):
        u = jax.nn.relu(lin(u, p[22 + 2 * i], p[23 + 2 * i]))
    u = lin(u, p[30], p[31])
    a = jnp.concatenate([r, bb] + [u] * r_dim, axis=1)
    return jnp.abs(a)


def actor_packed_reference(x, packed, rb_cols, out_dim):
    """Mirrors the kernel's packed/bf16-at-dot math exactly (tight check)."""
    w_in, b_in, w_u, b_u, w_hn, w_hu, b_h = packed
    dot = lambda a, w: jnp.dot(a.astype(jnp.bfloat16), w,
                               preferred_element_type=jnp.float32)
    x = jnp.abs(x.astype(jnp.float32))
    net = dot(x, w_in) + b_in
    u = net
    for i in range(4):
        u = jnp.maximum(dot(u, w_u[i]) + b_u[i], 0.0)
    y = dot(net, w_hn) + dot(u, w_hu) + b_h
    cols = jnp.arange(y.shape[1])[None, :]
    y = jnp.where(cols < rb_cols, jnp.maximum(y, 0.0), jnp.abs(y))
    return y[:, :out_dim]


if __name__ == "__main__":
    batch = 8
    state_dim = 16
    hidden_dim = 32
    r_dim = 4
    b_dim = 8
    o_dim = 16
    u_dim = o_dim // r_dim
    out_dim = r_dim + b_dim + r_dim * u_dim

    key = jax.random.PRNGKey(0)
    kx, kp = jax.random.split(key)
    x = jax.random.normal(kx, (batch, state_dim), jnp.float32)
    params = make_actor_params(kp, state_dim, r_dim, b_dim, o_dim, hidden_dim)
    packed = pack_actor_params(params, hidden_dim=hidden_dim, r_dim=r_dim,
                               b_dim=b_dim, u_dim=u_dim)

    out = actor_forward(x, packed, hidden_dim=hidden_dim, r_dim=r_dim,
                        b_dim=b_dim, u_dim=u_dim)
    out = jax.block_until_ready(out)
    assert out.shape == (batch, out_dim)

    # Tight check: same packed weights + bf16 dot boundaries as the kernel.
    ref_packed = actor_packed_reference(x, packed, r_dim + b_dim, out_dim)
    assert jnp.allclose(out, ref_packed, atol=1e-4, rtol=1e-4)

    # Loose check against the full-f32 PyTorch-semantics reference
    # (difference: f32 fold associativity + bf16 rounding at dot boundaries).
    ref_f32 = actor_reference(x, params, r_dim, b_dim, o_dim)
    assert jnp.allclose(out, ref_f32, atol=5e-3, rtol=5e-2)

    print("KERNEL_OK")
</pallas_src>

<mosaic_0001>
module attributes {stable_mosaic.version = 11 : i64} {
  func.func @_actor_kernel(%arg0: i32, %arg1: memref<8x16xf32, #tpu.memory_space<vmem>>, %arg2: memref<16x32xbf16, #tpu.memory_space<vmem>>, %arg3: memref<1x32xf32, #tpu.memory_space<vmem>>, %arg4: memref<4x32x32xbf16, #tpu.memory_space<vmem>>, %arg5: memref<4x1x32xf32, #tpu.memory_space<vmem>>, %arg6: memref<32x128xbf16, #tpu.memory_space<vmem>>, %arg7: memref<32x128xbf16, #tpu.memory_space<vmem>>, %arg8: memref<1x128xf32, #tpu.memory_space<vmem>>, %arg9: memref<8x128xf32, #tpu.memory_space<vmem>>) attributes {dimension_semantics = [#tpu.dimension_semantics<parallel>], iteration_bounds = array<i64: 1>, scalar_prefetch = 0 : i64, scratch_operands = 0 : i64, tpu.core_type = #tpu.core_type<tc>, window_params = [{transform_indices = @transform_0, window_bounds = array<i64: 8, 16>}, {pipeline_mode = #tpu.pipeline_mode<synchronous>, transform_indices = @transform_1, window_bounds = array<i64: 16, 32>}, {pipeline_mode = #tpu.pipeline_mode<synchronous>, transform_indices = @transform_2, window_bounds = array<i64: 1, 32>}, {pipeline_mode = #tpu.pipeline_mode<synchronous>, transform_indices = @transform_3, window_bounds = array<i64: 4, 32, 32>}, {pipeline_mode = #tpu.pipeline_mode<synchronous>, transform_indices = @transform_4, window_bounds = array<i64: 4, 1, 32>}, {pipeline_mode = #tpu.pipeline_mode<synchronous>, transform_indices = @transform_5, window_bounds = array<i64: 32, 128>}, {pipeline_mode = #tpu.pipeline_mode<synchronous>, transform_indices = @transform_6, window_bounds = array<i64: 32, 128>}, {pipeline_mode = #tpu.pipeline_mode<synchronous>, transform_indices = @transform_7, window_bounds = array<i64: 1, 128>}, {transform_indices = @transform_8, window_bounds = array<i64: 8, 128>}]} {
    %c0 = arith.constant 0 : index
    %c0_0 = arith.constant 0 : index
    %0 = vector.load %arg1[%c0, %c0_0] : memref<8x16xf32, #tpu.memory_space<vmem>>, vector<8x16xf32>
    %1 = math.absf %0 : vector<8x16xf32>
    %2 = arith.truncf %1 : vector<8x16xf32> to vector<8x16xbf16>
    %c0_1 = arith.constant 0 : index
    %c0_2 = arith.constant 0 : index
    %3 = vector.load %arg2[%c0_1, %c0_2] : memref<16x32xbf16, #tpu.memory_space<vmem>>, vector<16x32xbf16>
    %cst = arith.constant dense<0.000000e+00> : vector<8x32xf32>
    %4 = tpu.matmul %2, %3, %cst {dimension_numbers = #tpu.dot_dimension_numbers<[1], [0], [0], [1], [0, 0, 1, 1], [], []>} : vector<8x16xbf16>, vector<16x32xbf16>, vector<8x32xf32> -> vector<8x32xf32>
    %c0_3 = arith.constant 0 : index
    %c0_4 = arith.constant 0 : index
    %5 = vector.load %arg3[%c0_3, %c0_4] : memref<1x32xf32, #tpu.memory_space<vmem>>, vector<1x32xf32>
    %6 = vector.broadcast %5 : vector<1x32xf32> to vector<8x32xf32>
    %7 = arith.addf %4, %6 : vector<8x32xf32>
    %8 = arith.truncf %7 : vector<8x32xf32> to vector<8x32xbf16>
    %c0_5 = arith.constant 0 : index
    %c0_6 = arith.constant 0 : index
    %c0_7 = arith.constant 0 : index
    %9 = vector.load %arg4[%c0_5, %c0_6, %c0_7] : memref<4x32x32xbf16, #tpu.memory_space<vmem>>, vector<1x32x32xbf16>
    %10 = vector.shape_cast %9 : vector<1x32x32xbf16> to vector<32x32xbf16>
    %cst_8 = arith.constant dense<0.000000e+00> : vector<8x32xf32>
    %11 = tpu.matmul %8, %10, %cst_8 {dimension_numbers = #tpu.dot_dimension_numbers<[1], [0], [0], [1], [0, 0, 1, 1], [], []>} : vector<8x32xbf16>, vector<32x32xbf16>, vector<8x32xf32> -> vector<8x32xf32>
    %c0_9 = arith.constant 0 : index
    %c0_10 = arith.constant 0 : index
    %c0_11 = arith.constant 0 : index
    %12 = vector.load %arg5[%c0_9, %c0_10, %c0_11] : memref<4x1x32xf32, #tpu.memory_space<vmem>>, vector<1x1x32xf32>
    %13 = vector.shape_cast %12 : vector<1x1x32xf32> to vector<1x32xf32>
    %14 = vector.broadcast %13 : vector<1x32xf32> to vector<8x32xf32>
    %15 = arith.addf %11, %14 : vector<8x32xf32>
    %cst_12 = arith.constant 0.000000e+00 : f32
    %16 = vector.broadcast %cst_12 : f32 to vector<8x32xf32>
    %17 = arith.maximumf %15, %16 : vector<8x32xf32>
    %18 = arith.truncf %17 : vector<8x32xf32> to vector<8x32xbf16>
    %c1 = arith.constant 1 : index
    %c0_13 = arith.constant 0 : index
    %c0_14 = arith.constant 0 : index
    %19 = vector.load %arg4[%c1, %c0_13, %c0_14] : memref<4x32x32xbf16, #tpu.memory_space<vmem>>, vector<1x32x32xbf16>
    %20 = vector.shape_cast %19 : vector<1x32x32xbf16> to vector<32x32xbf16>
    %cst_15 = arith.constant dense<0.000000e+00> : vector<8x32xf32>
    %21 = tpu.matmul %18, %20, %cst_15 {dimension_numbers = #tpu.dot_dimension_numbers<[1], [0], [0], [1], [0, 0, 1, 1], [], []>} : vector<8x32xbf16>, vector<32x32xbf16>, vector<8x32xf32> -> vector<8x32xf32>
    %c1_16 = arith.constant 1 : index
    %c0_17 = arith.constant 0 : index
    %c0_18 = arith.constant 0 : index
    %22 = vector.load %arg5[%c1_16, %c0_17, %c0_18] : memref<4x1x32xf32, #tpu.memory_space<vmem>>, vector<1x1x32xf32>
    %23 = vector.shape_cast %22 : vector<1x1x32xf32> to vector<1x32xf32>
    %24 = vector.broadcast %23 : vector<1x32xf32> to vector<8x32xf32>
    %25 = arith.addf %21, %24 : vector<8x32xf32>
    %cst_19 = arith.constant 0.000000e+00 : f32
    %26 = vector.broadcast %cst_19 : f32 to vector<8x32xf32>
    %27 = arith.maximumf %25, %26 : vector<8x32xf32>
    %28 = arith.truncf %27 : vector<8x32xf32> to vector<8x32xbf16>
    %c2 = arith.constant 2 : index
    %c0_20 = arith.constant 0 : index
    %c0_21 = arith.constant 0 : index
    %29 = vector.load %arg4[%c2, %c0_20, %c0_21] : memref<4x32x32xbf16, #tpu.memory_space<vmem>>, vector<1x32x32xbf16>
    %30 = vector.shape_cast %29 : vector<1x32x32xbf16> to vector<32x32xbf16>
    %cst_22 = arith.constant dense<0.000000e+00> : vector<8x32xf32>
    %31 = tpu.matmul %28, %30, %cst_22 {dimension_numbers = #tpu.dot_dimension_numbers<[1], [0], [0], [1], [0, 0, 1, 1], [], []>} : vector<8x32xbf16>, vector<32x32xbf16>, vector<8x32xf32> -> vector<8x32xf32>
    %c2_23 = arith.constant 2 : index
    %c0_24 = arith.constant 0 : index
    %c0_25 = arith.constant 0 : index
    %32 = vector.load %arg5[%c2_23, %c0_24, %c0_25] : memref<4x1x32xf32, #tpu.memory_space<vmem>>, vector<1x1x32xf32>
    %33 = vector.shape_cast %32 : vector<1x1x32xf32> to vector<1x32xf32>
    %34 = vector.broadcast %33 : vector<1x32xf32> to vector<8x32xf32>
    %35 = arith.addf %31, %34 : vector<8x32xf32>
    %cst_26 = arith.constant 0.000000e+00 : f32
    %36 = vector.broadcast %cst_26 : f32 to vector<8x32xf32>
    %37 = arith.maximumf %35, %36 : vector<8x32xf32>
    %38 = arith.truncf %37 : vector<8x32xf32> to vector<8x32xbf16>
    %c3 = arith.constant 3 : index
    %c0_27 = arith.constant 0 : index
    %c0_28 = arith.constant 0 : index
    %39 = vector.load %arg4[%c3, %c0_27, %c0_28] : memref<4x32x32xbf16, #tpu.memory_space<vmem>>, vector<1x32x32xbf16>
    %40 = vector.shape_cast %39 : vector<1x32x32xbf16> to vector<32x32xbf16>
    %cst_29 = arith.constant dense<0.000000e+00> : vector<8x32xf32>
    %41 = tpu.matmul %38, %40, %cst_29 {dimension_numbers = #tpu.dot_dimension_numbers<[1], [0], [0], [1], [0, 0, 1, 1], [], []>} : vector<8x32xbf16>, vector<32x32xbf16>, vector<8x32xf32> -> vector<8x32xf32>
    %c3_30 = arith.constant 3 : index
    %c0_31 = arith.constant 0 : index
    %c0_32 = arith.constant 0 : index
    %42 = vector.load %arg5[%c3_30, %c0_31, %c0_32] : memref<4x1x32xf32, #tpu.memory_space<vmem>>, vector<1x1x32xf32>
    %43 = vector.shape_cast %42 : vector<1x1x32xf32> to vector<1x32xf32>
    %44 = vector.broadcast %43 : vector<1x32xf32> to vector<8x32xf32>
    %45 = arith.addf %41, %44 : vector<8x32xf32>
    %cst_33 = arith.constant 0.000000e+00 : f32
    %46 = vector.broadcast %cst_33 : f32 to vector<8x32xf32>
    %47 = arith.maximumf %45, %46 : vector<8x32xf32>
    %48 = arith.truncf %7 : vector<8x32xf32> to vector<8x32xbf16>
    %c0_34 = arith.constant 0 : index
    %c0_35 = arith.constant 0 : index
    %49 = vector.load %arg6[%c0_34, %c0_35] : memref<32x128xbf16, #tpu.memory_space<vmem>>, vector<32x128xbf16>
    %cst_36 = arith.constant dense<0.000000e+00> : vector<8x128xf32>
    %50 = tpu.matmul %48, %49, %cst_36 {dimension_numbers = #tpu.dot_dimension_numbers<[1], [0], [0], [1], [0, 0, 1, 1], [], []>} : vector<8x32xbf16>, vector<32x128xbf16>, vector<8x128xf32> -> vector<8x128xf32>
    %51 = arith.truncf %47 : vector<8x32xf32> to vector<8x32xbf16>
    %c0_37 = arith.constant 0 : index
    %c0_38 = arith.constant 0 : index
    %52 = vector.load %arg7[%c0_37, %c0_38] : memref<32x128xbf16, #tpu.memory_space<vmem>>, vector<32x128xbf16>
    %cst_39 = arith.constant dense<0.000000e+00> : vector<8x128xf32>
    %53 = tpu.matmul %51, %52, %cst_39 {dimension_numbers = #tpu.dot_dimension_numbers<[1], [0], [0], [1], [0, 0, 1, 1], [], []>} : vector<8x32xbf16>, vector<32x128xbf16>, vector<8x128xf32> -> vector<8x128xf32>
    %54 = arith.addf %50, %53 : vector<8x128xf32>
    %c0_40 = arith.constant 0 : index
    %c0_41 = arith.constant 0 : index
    %55 = vector.load %arg8[%c0_40, %c0_41] : memref<1x128xf32, #tpu.memory_space<vmem>>, vector<1x128xf32>
    %56 = vector.broadcast %55 : vector<1x128xf32> to vector<8x128xf32>
    %57 = arith.addf %54, %56 : vector<8x128xf32>
    %58 = tpu.iota {dimensions = array<i32: 1>} : vector<1x128xi32>
    %c12_i32 = arith.constant 12 : i32
    %59 = vector.broadcast %c12_i32 : i32 to vector<1x128xi32>
    %60 = arith.cmpi slt, %58, %59 : vector<1x128xi32>
    %cst_42 = arith.constant 0.000000e+00 : f32
    %61 = vector.broadcast %cst_42 : f32 to vector<8x128xf32>
    %62 = arith.maximumf %57, %61 : vector<8x128xf32>
    %63 = math.absf %57 : vector<8x128xf32>
    %64 = vector.shape_cast %60 : vector<1x128xi1> to vector<1x128xi1>
    %65 = vector.broadcast %64 : vector<1x128xi1> to vector<8x128xi1>
    %66 = arith.select %65, %62, %63 : vector<8x128xi1>, vector<8x128xf32>
    %c0_43 = arith.constant 0 : index
    %c0_44 = arith.constant 0 : index
    %67 = vector.load %arg9[%c0_43, %c0_44] : memref<8x128xf32, #tpu.memory_space<vmem>>, vector<8x128xf32>
    tpu.vector_store %arg9[%c0_43, %c0_44], %66 {strides = array<i32>} : memref<8x128xf32, #tpu.memory_space<vmem>>, vector<8x128xf32>,
    return
  }
  func.func @transform_0(%arg0: i32) -> (i32, i32) {
    %c0_i32 = arith.constant 0 : i32
    %c0_i32_0 = arith.constant 0 : i32
    return %arg0, %c0_i32 : i32, i32
  }
  func.func @transform_1(%arg0: i32) -> (i32, i32) {
    %c0_i32 = arith.constant 0 : i32
    %c0_i32_0 = arith.constant 0 : i32
    %c0_i32_1 = arith.constant 0 : i32
    return %c0_i32, %c0_i32_0 : i32, i32
  }
  func.func @transform_2(%arg0: i32) -> (i32, i32) {
    %c0_i32 = arith.constant 0 : i32
    %c0_i32_0 = arith.constant 0 : i32
    %c0_i32_1 = arith.constant 0 : i32
    return %c0_i32, %c0_i32_0 : i32, i32
  }
  func.func @transform_3(%arg0: i32) -> (i32, i32, i32) {
    %c0_i32 = arith.constant 0 : i32
    %c0_i32_0 = arith.constant 0 : i32
    %c0_i32_1 = arith.constant 0 : i32
    %c0_i32_2 = arith.constant 0 : i32
    return %c0_i32, %c0_i32_0, %c0_i32_1 : i32, i32, i32
  }
  func.func @transform_4(%arg0: i32) -> (i32, i32, i32) {
    %c0_i32 = arith.constant 0 : i32
    %c0_i32_0 = arith.constant 0 : i32
    %c0_i32_1 = arith.constant 0 : i32
    %c0_i32_2 = arith.constant 0 : i32
    return %c0_i32, %c0_i32_0, %c0_i32_1 : i32, i32, i32
  }
  func.func @transform_5(%arg0: i32) -> (i32, i32) {
    %c0_i32 = arith.constant 0 : i32
    %c0_i32_0 = arith.constant 0 : i32
    %c0_i32_1 = arith.constant 0 : i32
    return %c0_i32, %c0_i32_0 : i32, i32
  }
  func.func @transform_6(%arg0: i32) -> (i32, i32) {
    %c0_i32 = arith.constant 0 : i32
    %c0_i32_0 = arith.constant 0 : i32
    %c0_i32_1 = arith.constant 0 : i32
    return %c0_i32, %c0_i32_0 : i32, i32
  }
  func.func @transform_7(%arg0: i32) -> (i32, i32) {
    %c0_i32 = arith.constant 0 : i32
    %c0_i32_0 = arith.constant 0 : i32
    %c0_i32_1 = arith.constant 0 : i32
    return %c0_i32, %c0_i32_0 : i32, i32
  }
  func.func @transform_8(%arg0: i32) -> (i32, i32) {
    %c0_i32 = arith.constant 0 : i32
    %c0_i32_0 = arith.constant 0 : i32
    return %arg0, %c0_i32 : i32, i32
  }
}

</mosaic_0001>

<bundles_post_ra>
// kernel: tpu_custom_call.1
= control target key start
LH: loop header
LB: loop body
LE: loop exit
PB: predicated region body
PF: predicated region fallthrough
CT: control target
= control target key end

     0   :  { %13 = vsyncpa [#allocation3], 0  ;;  %s978_s0 = inlined_call_operand.hbm [shape: f32[8,16], index: 0, kind: input, shape index: {}]   ;;  %s979_s1 = inlined_call_operand.hbm [shape: bf16[16,32], index: 1, kind: input, shape index: {}]   ;;  %s980_s2 = inlined_call_operand.vmem [shape: f32[1,32], index: 2, kind: input, shape index: {}]   ;;  %s981_s3 = inlined_call_operand.hbm [shape: bf16[4,32,32], index: 3, kind: input, shape index: {}]   ;;  %s982_s4 = inlined_call_operand.vmem [shape: f32[4,1,32], index: 4, kind: input, shape index: {}]   ;;  %s983_s5 = inlined_call_operand.hbm [shape: bf16[32,128], index: 5, kind: input, shape index: {}]   ;;  %s984_s6 = inlined_call_operand.hbm [shape: bf16[32,128], index: 6, kind: input, shape index: {}]   ;;  %s985_s7 = inlined_call_operand.vmem [shape: f32[1,128], index: 7, kind: input, shape index: {}]   ;;  %s986_s8 = inlined_call_operand.hbm [shape: f32[8,128], index: 8, kind: output, shape index: {}]  }
   0x1   :  { %14 = vsyncpa [#allocation6], 0 }
   0x2   :  { %15 = vsyncpa [#allocation9], 0 }
   0x3   :  { %16 = vsyncpa [#allocation4], 0  ;;  %s842_s27 = smov [#allocation5]  }
   0x4   :  { %s32_s28 = sshll.u32 %s842_s27, 4  ;;  %s33_s28 = int_to_ptr.vmem [resolvable:$true] %s32_s28 }
   0x5   :  { %s722_s29 = scalar_lea.vmem %s33_s28, 128  ;;  %p727_p1 = scmp.lt.s32.totalorder %s33_s28, %s33_s28 }
   0x6   :  { %p723_p0 = scmp.ne.s32.totalorder %s33_s28, %s722_s29  ;;  %p728_p2 = scmp.lt.s32.totalorder %s722_s29, %s722_s29 }
   0x8   :  { %p729_p3 = por %p728_p2, %p727_p1 }
   0xa   :  { %p730_p4 = pnand %p729_p3, %p723_p0 }
   0xc   :  { %733 = shalt.err (!%p730_p4)
}
   0xd   :  { %s843_s30 = smov 64   ;;  %s844_s9 = smov 4  }
   0xe   :  { %38 = dma.hbm_to_vmem [thread:$0]  %s979_s1, 128, %s33_s28, [#allocation6], %s843_s30, %s843_s30, %s844_s9  }
   0xf   :  { %s845_s12 = smov [#allocation8]   ;;  %s846_s14 = smov [#allocation2]  }
  0x10   :  { %s60_s13 = sshll.u32 %s845_s12, 4  ;;  %s23_s15 = sshll.u32 %s846_s14, 4  ;;  %s61_s13 = int_to_ptr.vmem [resolvable:$true] %s60_s13  ;;  %s24_s15 = int_to_ptr.vmem [resolvable:$true] %s23_s15 }
  0x11   :  { %s742_s16 = scalar_lea.vmem %s61_s13, 256  ;;  %p747_p6 = scmp.lt.s32.totalorder %s61_s13, %s61_s13 }
  0x12   :  { %p743_p5 = scmp.ne.s32.totalorder %s61_s13, %s742_s16  ;;  %p748_p7 = scmp.lt.s32.totalorder %s742_s16, %s742_s16 }
  0x14   :  { %p749_p8 = por %p748_p7, %p747_p6 }
  0x16   :  { %p750_p9 = pnand %p749_p8, %p743_p5 }
  0x18   :  { %753 = shalt.err (!%p750_p9)
}
  0x19   :  { %66 = dma.hbm_to_vmem [thread:$0]  %s983_s5, 256, %s61_s13, [#allocation9], %s843_s30, %s843_s30, %s844_s9  }
  0x1a   :  { %s762_s1 = scalar_lea.vmem %s24_s15, 128  ;;  %p767_p11 = scmp.lt.s32.totalorder %s24_s15, %s24_s15 }
  0x1b   :  { %p763_p10 = scmp.ne.s32.totalorder %s24_s15, %s762_s1  ;;  %p768_p12 = scmp.lt.s32.totalorder %s762_s1, %s762_s1 }
  0x1d   :  { %p769_p13 = por %p768_p12, %p767_p11 }
  0x1f   :  { %p770_p0 = pnand %p769_p13, %p763_p10 }
  0x21   :  { %773 = shalt.err (!%p770_p0)
}
  0x22   :  { %26 = dma.hbm_to_vmem [thread:$0]  %s978_s0, 128, %s24_s15, [#allocation3]  }
  0x23   :  { %s847_s21 = smov [#allocation7]   ;;  %s848_s23 = smov [#allocation10]  }
  0x24   :  { %s46_s22 = sshll.u32 %s847_s21, 4  ;;  %s72_s24 = sshll.u32 %s848_s23, 4  ;;  %s47_s22 = int_to_ptr.vmem [resolvable:$true] %s46_s22  ;;  %s73_s24 = int_to_ptr.vmem [resolvable:$true] %s72_s24 }
  0x25   :  { %s782_s25 = scalar_lea.vmem %s47_s22, 1024  ;;  %p787_p2 = scmp.lt.s32.totalorder %s47_s22, %s47_s22 }
  0x26   :  { %p783_p1 = scmp.ne.s32.totalorder %s47_s22, %s782_s25  ;;  %p788_p3 = scmp.lt.s32.totalorder %s782_s25, %s782_s25 }
  0x28   :  { %p789_p4 = por %p788_p3, %p787_p2 }
  0x2a   :  { %p790_p5 = pnand %p789_p4, %p783_p1 }
  0x2c   :  { %793 = shalt.err (!%p790_p5)
}
  0x2d   :  { %52 = dma.hbm_to_vmem [thread:$0]  %s981_s3, 1024, %s47_s22, [#allocation6], %s843_s30, %s843_s30, %s844_s9  }
  0x2e   :  { %s802_s0 = scalar_lea.vmem %s73_s24, 256  ;;  %p807_p7 = scmp.lt.s32.totalorder %s73_s24, %s73_s24 }
  0x2f   :  { %p803_p6 = scmp.ne.s32.totalorder %s73_s24, %s802_s0  ;;  %p808_p8 = scmp.lt.s32.totalorder %s802_s0, %s802_s0 }
  0x31   :  { %p809_p9 = por %p808_p8, %p807_p7 }
  0x33   :  { %p810_p10 = pnand %p809_p9, %p803_p6 }
  0x35   :  { %813 = shalt.err (!%p810_p10)
}
  0x36   :  { %78 = dma.hbm_to_vmem [thread:$0]  %s984_s6, 256, %s73_s24, [#allocation9], %s843_s30, %s843_s30, %s844_s9  }
  0x37   :  { %834 = dma.done.wait [#allocation3], 128  }
  0x38   :  { %835 = vsyncadd [#allocation3], 4294967168 }
  0x39   :  { %836 = dma.done.wait [#allocation6], 1152  }
  0x3a   :  { %837 = vsyncadd [#allocation6], 4294966144 }
  0x3b   :  { %838 = dma.done.wait [#allocation9], 512  }
  0x3c   :  { %839 = vsyncadd [#allocation9], 4294966784  ;;  %v849_v0 = vmov 0.0   ;;  %vm850_vm0 = vmmov 0   ;;  %v701_v1 = vld [vmem:[#allocation5] sm:$0xff]   ;;  %v97_v2 = vld [vmem:[#allocation2] sm:$0xff]  ;;  %v562_v60 = vlaneseq }
  0x3d   :  { %637 = vmatprep.subr.bf16.mxu0 %v849_v0  ;;  %639 = vmatprep.mubr.msk.bf16.mxu0 %vm850_vm0, %v849_v0  ;;  %v98_v3 = vand.u32 2147483647, %v97_v2  ;;  %vm115_vm1 = vcmask 130048   ;;  %v702_v4 = vld [vmem:[#allocation7 + $0x8] sm:$0xff]   ;;  %v703_v6 = vld [vmem:[#allocation7] sm:$0xff]   ;;  %v704_v7 = vld [vmem:[#allocation7 + $0x18] sm:$0xff]  }
  0x3e   :  { %643 = vmatprep.subr.bf16.mxu1 %v849_v0  ;;  %647 = vmatprep.mubr.msk.bf16.mxu1 %vm850_vm0, %v849_v0  ;;  %v588_v8 = vld [vmem:[%s980_s2] ss:$0 sm:$0xff]  ;;  %vm183_vm2 = vcmask 261120   ;;  %v706_v16 = vld [vmem:[#allocation7 + $0x28] sm:$0xff]   ;;  %v707_v25 = vld [vmem:[#allocation7 + $0x20] sm:$0xff]   ;;  %v563_v63 = vand.u32 127, %v562_v60 }
  0x3f   :  { %638 = vmatpush3.bf16.msra.mxu0 %v701_v1  ;;  %v99_v5 = vpack.c.bf16 %v98_v3, %v98_v3  ;;  %644 = vmatpush3.bf16.msra.mxu1 %v702_v4  ;;  %v705_v15 = vld [vmem:[#allocation7 + $0x10] sm:$0xff]   ;;  %v708_v26 = vld [vmem:[#allocation7 + $0x38] sm:$0xff]   ;;  %v710_v43 = vld [vmem:[#allocation8 + $0x8] sm:$0xff]  }
  0x40   :  { %651 = vmatprep.subr.bf16.mxu0 %v849_v0  ;;  %645 = vmatprep.subr.bf16.mxu1 %v849_v0  ;;  %v591_v17 = vld [vmem:[%s982_s4] ss:$0 sm:$0xff]  ;;  %v596_v27 = vld [vmem:[%s982_s4 + $0x1] ss:$0 sm:$0xff]  ;;  %v712_v36 = vld [vmem:[#allocation10 + $0x8] sm:$0xff]   ;;  %vm564_vm3 = vcmp.lt.s32.totalorder %v563_v63, 12 }
  0x41   :  { %v709_v35 = vld [vmem:[#allocation7 + $0x30] sm:$0xff]   ;;  %v711_v46 = vld [vmem:[#allocation8] sm:$0xff]  }
  0x42   :  { %640 = vmatmul.mubr.msk.bf16.vlgmr.msra.gmra.mxu0 %vm115_vm1, %v99_v5  ;;  %v601_v37 = vld [vmem:[%s982_s4 + $0x2] ss:$0 sm:$0xff]  ;;  %v606_v48 = vld [vmem:[%s982_s4 + $0x3] ss:$0 sm:$0xff]  ;;  %v616_v62 = vld [vmem:[%s985_s7] ss:$0 sm:$0xff] }
  0x43   :  { %655 = vmatprep.mubr.msk.bf16.mxu0 %vm850_vm0, %v849_v0  ;;  %646 = vmatpush3.bf16.msra.mxu1 %v703_v6  ;;  %v713_v47 = vld [vmem:[#allocation10] sm:$0xff]   ;;  %s851_s4 = smov [#allocation11]  }
  0x44   :  { %659 = vmatprep.subr.bf16.mxu1 %v849_v0  ;;  %652 = vmatpush3.bf16.msra.mxu0 %v704_v7  ;;  %s577_s16 = sshll.u32 %s851_s4, 4  ;;  %s578_s16 = int_to_ptr.vmem [resolvable:$true] %s577_s16 }
  0x45   :  { %653 = vmatprep.subr.bf16.mxu0 %v849_v0  ;;  %s814_s17 = scalar_lea.vmem %s578_s16, 128  ;;  %p819_p12 = scmp.lt.s32.totalorder %s578_s16, %s578_s16 }
  0x46   :  { %p815_p11 = scmp.ne.s32.totalorder %s578_s16, %s814_s17  ;;  %p820_p13 = scmp.lt.s32.totalorder %s814_s17, %s814_s17 }
  0x48   :  { %654 = vmatpush3.bf16.msra.mxu0 %v705_v15  ;;  %p821_p0 = por %p820_p13, %p819_p12 }
  0x49   :  { %667 = vmatprep.subr.bf16.mxu0 %v849_v0 }
  0x4a   :  { %p822_p1 = pnand %p821_p0, %p815_p11 }
 0x102   :  { %v153_v9 = vpop.f32.mrf.mxu0 }
 0x103   :  { %v154_v10 = vadd.f32 %v588_v8, %v153_v9 }
 0x104   :  { %v641_v11 = vpop.f32.mrf.mxu0 }
 0x105   :  { %v159_v12 = vpack.c.bf16 %v154_v10, %v154_v10 }
 0x106   :  { %v156_v13 = vpop.f32.mrf.mxu0 }
 0x107   :  { %648 = vmatmul.mubr.msk.bf16.vlgmr.msra.gmra.mxu1 %vm183_vm2, %v159_v12 }
 0x108   :  { %v642_v14 = vpop.f32.mrf.mxu0  ;;  %663 = vmatprep.mubr.msk.bf16.mxu1 %vm850_vm0, %v849_v0  ;;  %660 = vmatpush3.bf16.msra.mxu1 %v706_v16 }
 0x109   :  { %661 = vmatprep.subr.bf16.mxu1 %v849_v0 }
 0x10c   :  { %662 = vmatpush3.bf16.msra.mxu1 %v707_v25 }
 0x10d   :  { %675 = vmatprep.subr.bf16.mxu1 %v849_v0 }
 0x1c7   :  { %v221_v18 = vpop.f32.mrf.mxu1 }
 0x1c8   :  { %v222_v19 = vadd.f32 %v591_v17, %v221_v18 }
 0x1c9   :  { %v649_v20 = vpop.f32.mrf.mxu1 }
 0x1ca   :  { %v227_v21 = vmax.f32 %v222_v19, 0.0 }
 0x1cb   :  { %v224_v22 = vpop.f32.mrf.mxu1 }
 0x1cc   :  { %v228_v23 = vpack.c.bf16 %v227_v21, %v227_v21 }
 0x1cd   :  { %v650_v24 = vpop.f32.mrf.mxu1 }
 0x1ce   :  { %656 = vmatmul.mubr.msk.bf16.vlgmr.msra.gmra.mxu0 %vm183_vm2, %v228_v23 }
 0x1cf   :  { %671 = vmatprep.mubr.msk.bf16.mxu0 %vm850_vm0, %v849_v0  ;;  %668 = vmatpush3.bf16.msra.mxu0 %v708_v26 }
 0x1d0   :  { %669 = vmatprep.subr.bf16.mxu0 %v849_v0 }
 0x1d3   :  { %670 = vmatpush3.bf16.msra.mxu0 %v709_v35 }
 0x1d4   :  { %683 = vmatprep.subr.bf16.mxu0 %v849_v0 }
 0x28e   :  { %v291_v28 = vpop.f32.mrf.mxu0 }
 0x28f   :  { %v292_v29 = vadd.f32 %v596_v27, %v291_v28 }
 0x290   :  { %v657_v30 = vpop.f32.mrf.mxu0 }
 0x291   :  { %v297_v31 = vmax.f32 %v292_v29, 0.0 }
 0x292   :  { %v294_v32 = vpop.f32.mrf.mxu0 }
 0x293   :  { %v298_v33 = vpack.c.bf16 %v297_v31, %v297_v31 }
 0x294   :  { %v658_v34 = vpop.f32.mrf.mxu0 }
 0x295   :  { %664 = vmatmul.mubr.msk.bf16.vlgmr.msra.gmra.mxu1 %vm183_vm2, %v298_v33 }
 0x296   :  { %679 = vmatprep.mubr.msk.bf16.mxu1 %vm850_vm0, %v849_v0  ;;  %676 = vmatpush3.bf16.msra.mxu1 %v712_v36 }
 0x297   :  { %677 = vmatprep.subr.bf16.mxu1 %v849_v0 }
 0x29a   :  { %678 = vmatpush3.bf16.msra.mxu1 %v713_v47 }
 0x355   :  { %v361_v38 = vpop.f32.mrf.mxu1 }
 0x356   :  { %v362_v39 = vadd.f32 %v601_v37, %v361_v38 }
 0x357   :  { %v665_v40 = vpop.f32.mrf.mxu1 }
 0x358   :  { %v367_v41 = vmax.f32 %v362_v39, 0.0 }
 0x359   :  { %v364_v42 = vpop.f32.mrf.mxu1 }
 0x35a   :  { %v368_v44 = vpack.c.bf16 %v367_v41, %v367_v41 }
 0x35b   :  { %v666_v45 = vpop.f32.mrf.mxu1 }
 0x35c   :  { %672 = vmatmul.mubr.msk.bf16.vlgmr.msra.gmra.mxu0 %vm183_vm2, %v368_v44 }
 0x35d   :  { %684 = vmatpush3.bf16.msra.mxu0 %v710_v43  ;;  %687 = vmatprep.mubr.msk.bf16.mxu0 %vm850_vm0, %v849_v0 }
 0x35e   :  { %685 = vmatprep.subr.bf16.mxu0 %v849_v0 }
 0x361   :  { %686 = vmatpush3.bf16.msra.mxu0 %v711_v46 }
 0x364   :  { %688 = vmatmul.mubr.msk.bf16.vlgmr.msra.gmra.mxu0 %vm183_vm2, %v159_v12 }
 0x41c   :  { %v431_v49 = vpop.f32.mrf.mxu0 }
 0x41d   :  { %v432_v50 = vadd.f32 %v606_v48, %v431_v49 }
 0x41e   :  { %v673_v51 = vpop.f32.mrf.mxu0 }
 0x41f   :  { %v437_v52 = vmax.f32 %v432_v50, 0.0 }
 0x420   :  { %v434_v53 = vpop.f32.mrf.mxu0 }
 0x421   :  { %v442_v54 = vpack.c.bf16 %v437_v52, %v437_v52 }
 0x422   :  { %v674_v55 = vpop.f32.mrf.mxu0 }
 0x423   :  { %680 = vmatmul.mubr.msk.bf16.vlgmr.msra.gmra.mxu1 %vm183_vm2, %v442_v54 }
 0x424   :  { %v548_v56 = vpop.f32.mrf.mxu0 }
 0x426   :  { %v689_v57 = vpop.f32.mrf.mxu0 }
 0x428   :  { %v551_v58 = vpop.f32.mrf.mxu0 }
 0x42a   :  { %v690_v59 = vpop.f32.mrf.mxu0 }
 0x4e3   :  { %v496_v61 = vpop.f32.mrf.mxu1 }
 0x4e4   :  { %v549_v0 = vadd.f32 %v548_v56, %v496_v61 }
 0x4e5   :  { %v681_v1 = vpop.f32.mrf.mxu1 }
 0x4e6   :  { %v561_v2 = vadd.f32 %v616_v62, %v549_v0 }
 0x4e7   :  { %v499_v3 = vpop.f32.mrf.mxu1 }
 0x4e8   :  { %v565_v4 = vmax.f32 %v561_v2, 0.0  ;;  %v566_v5 = vand.u32 2147483647, %v561_v2 }
 0x4e9   :  { %v682_v6 = vpop.f32.mrf.mxu1 }
 0x4ea   :  { %v569_v7 = vsel %vm564_vm3, %v565_v4, %v566_v5 }
 0x4eb   :  { %570 = vst [vmem:[#allocation11] sm:$0xff] %v569_v7 }
 0x4ec   :  { %825 = shalt.err (!%p822_p1)
}
 0x4ed   :  { %580 = dma.vmem_to_hbm [thread:$0]  %s578_s16, 128, %s986_s8, [#allocation4]  }
 0x4ee   :  { %840 = dma.done.wait [#allocation4], 128  }
 0x4ef   :  { %841 = vsyncadd [#allocation4], 4294967168 }
 0x4f0   :  { %584 = vsyncpa [#allocation3], 1 }
 0x4f1   :  { %585 = vsyncpa [#allocation6], 1 }
 0x4f2   :  { %586 = vsyncpa [#allocation9], 1 }
 0x4f3   :  { %587 = vsyncpa [#allocation4], 1 }

</bundles_post_ra>
